<compile_context>
chip_gen: v5e
topology: v5e:2x2
jax: 0.10.0
libtpu: 0.0.40
codegen_flags: <defaults>
</compile_context>

<pallas_src>
import math

import jax
import jax.numpy as jnp
import numpy as np
from jax.experimental import pallas as pl
from jax.experimental.pallas import tpu as pltpu

LN_EPS = 1e-6
INV_SQRT2 = 1.0 / math.sqrt(2.0)


def _recip(x):
    # EUP approximate reciprocal + one Newton-Raphson step (moves the divide off
    # the VALU slots onto the otherwise-idle EUP, keeps ~f32 accuracy).
    r = pl.reciprocal(x, approx=True)
    return r * (2.0 - x * r)


def _erf(x):
    # Abramowitz & Stegun 7.1.26 rational approximation (max abs err ~1.5e-7).
    a1, a2, a3, a4, a5 = 0.254829592, -0.284496736, 1.421413741, -1.453152027, 1.061405429
    p = 0.3275911
    sgn = jnp.where(x >= 0.0, 1.0, -1.0)
    ax = jnp.abs(x)
    t = _recip(1.0 + p * ax)
    poly = ((((a5 * t + a4) * t + a3) * t + a2) * t + a1) * t
    return sgn * (1.0 - poly * jnp.exp(-ax * ax))


def _layer_norm(x, gamma, beta):
    # Matches the custom PyTorch LayerNorm: unbiased std (divide by N-1) and
    # normalization by (std + eps), not sqrt(var + eps).
    n = x.shape[-1]
    mean = jnp.mean(x, axis=-1, keepdims=True)
    xm = x - mean
    var = jnp.sum(xm * xm, axis=-1, keepdims=True) * (1.0 / (n - 1))
    std = jnp.sqrt(var)
    return gamma * (xm * _recip(std + LN_EPS)) + beta


def transformer_layer_kernel(
    x_ref,              # [B, E]   input `sen` (resident across the F grid)
    wvo_ref, bvo_ref,   # [E, E], [1, E]   folded Wv@Wo  /  bv@Wo + bo
    g1_ref, be1_ref,    # [1, E]           layer_norm_1 gamma / beta
    w1_ref, b1_ref,     # [E, TF], [1, TF] feed_forward.linear_1 (F-tiled)
    w2_ref, b2_ref,     # [TF, E], [1, E]  feed_forward.linear_2 (F-tiled)
    g2_ref, be2_ref,    # [1, E]           layer_norm_2 gamma / beta
    out_ref,            # [B, E]
    inter_ref,          # VMEM scratch [B, E] f32 : LN1 output, reused every step
    ff_ref,             # VMEM scratch [B, E] f32 : FFN accumulator over F tiles
):
    k = pl.program_id(0)
    nk = pl.num_programs(0)

    # --- step 0: attention (seq_len==1 => softmax==1 => context==V) + LN1 ---
    @pl.when(k == 0)
    def _init():
        x = x_ref[...].astype(jnp.float32)
        attn = jnp.dot(x.astype(wvo_ref.dtype), wvo_ref[...],
                       preferred_element_type=jnp.float32) + bvo_ref[...]
        # residual + LayerNorm 1 (dropout_1 is identity at inference)
        inter_ref[...] = _layer_norm(attn + x, g1_ref[...], be1_ref[...])
        ff_ref[...] = jnp.zeros_like(ff_ref)

    # --- every step: one F-slab of the PositionwiseFeedForward (exact-erf GELU) ---
    inter = inter_ref[...]
    h = jnp.dot(inter.astype(w1_ref.dtype), w1_ref[...],
                preferred_element_type=jnp.float32) + b1_ref[...]
    h = h * 0.5 * (1.0 + _erf(h * INV_SQRT2))
    ff_ref[...] += jnp.dot(h.astype(w2_ref.dtype), w2_ref[...],
                           preferred_element_type=jnp.float32)

    # --- last step: bias + residual + LayerNorm 2, store ---
    @pl.when(k == nk - 1)
    def _finalize():
        ff = ff_ref[...] + b2_ref[...]
        out = _layer_norm(ff + inter_ref[...], g2_ref[...], be2_ref[...])
        out_ref[...] = out.astype(out_ref.dtype)


def _pick_f_tile(E, F, weight_itemsize, budget_bytes=16 << 20):
    """Largest halving of F whose double-buffered (w1+w2) tiles fit the budget."""
    tf = F
    # 2 weight tiles (E x tf and tf x E) x 2 pipeline buffers.
    while tf % 2 == 0 and tf > 128 and 4 * E * tf * weight_itemsize > budget_bytes:
        tf //= 2
    return tf


def encoder_forward(sen, params, layers_num, *, tf=None):
    """sen: [B, E] float32.  params: kernel-side dict of per-layer-stacked weights.

    The PyTorch Encoder feeds `sen` to every layer and returns only the last
    layer's output, so only layer `layers_num - 1` is computed.
    """
    B, E = sen.shape
    F = params["w1"].shape[-1]
    l = layers_num - 1

    w_vo, b_vo = params["w_vo"][l], params["b_vo"][l]
    g1, be1 = params["gamma1"][l], params["beta1"][l]
    w1, b1 = params["w1"][l], params["b1"][l]
    w2, b2 = params["w2"][l], params["b2"][l]
    g2, be2 = params["gamma2"][l], params["beta2"][l]

    w_itemsize = jnp.dtype(w1.dtype).itemsize
    if tf is None:
        tf = _pick_f_tile(E, F, w_itemsize)
    assert F % tf == 0, f"F tile {tf} must divide feedforward size {F}"
    nk = F // tf

    def const_spec(shape):
        return pl.BlockSpec(shape, lambda k: (0, 0))

    in_specs = [
        const_spec((B, E)),                        # x (resident)
        const_spec((E, E)),                        # w_vo (resident)
        const_spec((1, E)),                        # b_vo
        const_spec((1, E)),                        # gamma1
        const_spec((1, E)),                        # beta1
        pl.BlockSpec((E, tf), lambda k: (0, k)),   # w1 (F-tiled, double-buffered)
        pl.BlockSpec((1, tf), lambda k: (0, k)),   # b1 (follows the F tiling)
        pl.BlockSpec((tf, E), lambda k: (k, 0)),   # w2 (F-tiled, double-buffered)
        const_spec((1, E)),                        # b2
        const_spec((1, E)),                        # gamma2
        const_spec((1, E)),                        # beta2
    ]
    out_specs = pl.BlockSpec((B, E), lambda k: (0, 0))

    # VMEM budget: conservatively assume 2 buffers for every block + scratch.
    act = 4
    need = (2 * B * E * act                      # x
            + 2 * E * E * w_itemsize             # w_vo
            + 2 * 6 * E * act                    # six [1,E] vectors
            + 2 * E * tf * w_itemsize            # w1 tiles
            + 2 * tf * act                       # b1 tiles
            + 2 * tf * E * w_itemsize            # w2 tiles
            + 2 * B * E * act                    # out
            + 2 * B * E * act)                   # inter + ff scratch
    # Cap at 48 MiB so the same build stays inside v7x's 64 MiB physical VMEM;
    # v5e/v6e have 128 MiB physical so this is always safe.
    vmem_limit = int(min(max(2 * need, 32 << 20), 48 << 20))

    cost = pl.CostEstimate(
        flops=2 * B * (E * E + 2 * E * F),
        transcendentals=B * F,                   # one exp per GELU element
        bytes_accessed=(2 * B * E * act          # sen + out
                        + (E * E + 2 * E * F) * w_itemsize
                        + (6 * E + F) * act),
    )

    return pl.pallas_call(
        transformer_layer_kernel,
        out_shape=jax.ShapeDtypeStruct((B, E), sen.dtype),
        grid_spec=pltpu.PrefetchScalarGridSpec(
            num_scalar_prefetch=0,
            grid=(nk,),
            in_specs=in_specs,
            out_specs=out_specs,
            scratch_shapes=[pltpu.VMEM((B, E), jnp.float32),    # inter (LN1 out)
                            pltpu.VMEM((B, E), jnp.float32)]),  # ff accumulator
        compiler_params=pltpu.CompilerParams(
            dimension_semantics=("arbitrary",),
            vmem_limit_bytes=vmem_limit),
        cost_estimate=cost,
    )(sen, w_vo, b_vo, g1, be1, w1, b1, w2, b2, g2, be2)


# ------------------------- parameter init (deterministic) -------------------------

def _linear_init(key, fan_in, fan_out):
    # PyTorch nn.Linear default init: U(-1/sqrt(fan_in), 1/sqrt(fan_in)).
    k1, k2 = jax.random.split(key)
    bound = 1.0 / math.sqrt(fan_in)
    # Stored as [in, out] so the kernel computes x @ W (== x @ W_torch.T).
    w = jax.random.uniform(k1, (fan_in, fan_out), jnp.float32, -bound, bound)
    b = jax.random.uniform(k2, (1, fan_out), jnp.float32, -bound, bound)
    return w, b


def init_encoder_params(key, layers_num, emb, ff, weight_dtype=jnp.bfloat16):
    """Returns (kernel_params, ref_params).

    kernel_params: folded Wv@Wo / bv@Wo+bo (computed ONCE here, not per call),
    big weights cast to `weight_dtype`; biases / LN params kept in f32.
    ref_params: unfolded f32 master weights for the faithful reference.
    Q/K projection weights never influence the output (seq_len==1 => softmax==1)
    and are not materialized.
    """
    kern, ref = [], []
    for lk in jax.random.split(key, layers_num):
        ks = jax.random.split(lk, 4)
        wv, bv = _linear_init(ks[0], emb, emb)
        wo, bo = _linear_init(ks[1], emb, emb)
        w1, b1 = _linear_init(ks[2], emb, ff)
        w2, b2 = _linear_init(ks[3], ff, emb)
        # Fold the attention value + output projections once, at init time.
        w_vo = jnp.dot(wv, wo, preferred_element_type=jnp.float32)
        b_vo = jnp.dot(bv, wo, preferred_element_type=jnp.float32) + bo
        ones = jnp.ones((1, emb), jnp.float32)
        zeros = jnp.zeros((1, emb), jnp.float32)
        kern.append(dict(
            w_vo=w_vo.astype(weight_dtype), b_vo=b_vo,
            gamma1=ones, beta1=zeros,
            w1=w1.astype(weight_dtype), b1=b1,
            w2=w2.astype(weight_dtype), b2=b2,
            gamma2=ones, beta2=zeros,
        ))
        ref.append(dict(
            wv=wv, bv=bv, wo=wo, bo=bo,
            gamma1=ones, beta1=zeros,
            w1=w1, b1=b1, w2=w2, b2=b2,
            gamma2=ones, beta2=zeros,
        ))
    stack = lambda ds: {k: jnp.stack([d[k] for d in ds], axis=0) for k in ds[0]}
    return stack(kern), stack(ref)


# ------------------------- pure-JAX reference for validation -------------------------

def encoder_reference(sen, rparams, layers_num):
    # Faithful loop over ALL layers with UNFOLDED f32 projections; validates both
    # the "only the last layer is observable" reduction and the Wv@Wo fold.
    def ln(y, g, b):
        n = y.shape[-1]
        mean = y.mean(-1, keepdims=True)
        ym = y - mean
        std = jnp.sqrt((ym * ym).sum(-1, keepdims=True) / (n - 1))
        return g * ym / (std + LN_EPS) + b

    out = None
    for l in range(layers_num):
        x = sen                                   # Encoder feeds `sen` to every layer
        v = x @ rparams["wv"][l] + rparams["bv"][l]
        attn = v @ rparams["wo"][l] + rparams["bo"][l]
        inter = ln(attn + x, rparams["gamma1"][l], rparams["beta1"][l])
        h = inter @ rparams["w1"][l] + rparams["b1"][l]
        h = h * 0.5 * (1.0 + jax.scipy.special.erf(h / math.sqrt(2.0)))
        ffo = h @ rparams["w2"][l] + rparams["b2"][l]
        out = ln(ffo + inter, rparams["gamma2"][l], rparams["beta2"][l])
    return out


if __name__ == "__main__":
    # Correctness-test shapes only (benchmark at production dims with E a
    # multiple of 128 for lane-dense stores).  TF=128 forces a 2-step F grid so
    # the scratch accumulator / pl.when init+finalize paths are exercised.
    B, EMB, HEADS, FF, LAYERS = 8, 32, 4, 256, 2   # per_head = EMB // HEADS = 8
    TF = 128

    key = jax.random.PRNGKey(0)
    kx, kp = jax.random.split(key)
    sen = jax.random.normal(kx, (B, EMB), jnp.float32)
    ref = encoder_reference(sen, init_encoder_params(kp, LAYERS, EMB, FF)[1], LAYERS)

    # 1) Tight check with f32 weights: validates grid/accumulator/LN/GELU math.
    kparams32, _ = init_encoder_params(kp, LAYERS, EMB, FF, weight_dtype=jnp.float32)
    out32 = jax.block_until_ready(encoder_forward(sen, kparams32, LAYERS, tf=TF))
    np.testing.assert_allclose(np.asarray(out32), np.asarray(ref), atol=2e-4, rtol=2e-4)

    # 2) Production path: bf16-streamed weights; loose tolerance vs the f32 module.
    kparams16, _ = init_encoder_params(kp, LAYERS, EMB, FF, weight_dtype=jnp.bfloat16)
    out16 = jax.block_until_ready(encoder_forward(sen, kparams16, LAYERS, tf=TF))
    np.testing.assert_allclose(np.asarray(out16), np.asarray(ref), atol=7.5e-2, rtol=7.5e-2)

    print("KERNEL_OK")
</pallas_src>

<mosaic_0001>
module attributes {stable_mosaic.version = 11 : i64} {
  func.func @transformer_layer_kernel(%arg0: i32, %arg1: memref<8x32xf32, #tpu.memory_space<vmem>>, %arg2: memref<32x32xf32, #tpu.memory_space<vmem>>, %arg3: memref<1x32xf32, #tpu.memory_space<vmem>>, %arg4: memref<1x32xf32, #tpu.memory_space<vmem>>, %arg5: memref<1x32xf32, #tpu.memory_space<vmem>>, %arg6: memref<32x128xf32, #tpu.memory_space<vmem>>, %arg7: memref<1x128xf32, #tpu.memory_space<vmem>>, %arg8: memref<128x32xf32, #tpu.memory_space<vmem>>, %arg9: memref<1x32xf32, #tpu.memory_space<vmem>>, %arg10: memref<1x32xf32, #tpu.memory_space<vmem>>, %arg11: memref<1x32xf32, #tpu.memory_space<vmem>>, %arg12: memref<8x32xf32, #tpu.memory_space<vmem>>, %arg13: memref<8x32xf32, #tpu.memory_space<vmem>>, %arg14: memref<8x32xf32, #tpu.memory_space<vmem>>) attributes {dimension_semantics = [#tpu.dimension_semantics<arbitrary>], iteration_bounds = array<i64: 2>, scalar_prefetch = 0 : i64, scratch_operands = 2 : i64, tpu.core_type = #tpu.core_type<tc>, window_params = [{pipeline_mode = #tpu.pipeline_mode<synchronous>, transform_indices = @transform_0, window_bounds = array<i64: 8, 32>}, {pipeline_mode = #tpu.pipeline_mode<synchronous>, transform_indices = @transform_1, window_bounds = array<i64: 32, 32>}, {pipeline_mode = #tpu.pipeline_mode<synchronous>, transform_indices = @transform_2, window_bounds = array<i64: 1, 32>}, {pipeline_mode = #tpu.pipeline_mode<synchronous>, transform_indices = @transform_3, window_bounds = array<i64: 1, 32>}, {pipeline_mode = #tpu.pipeline_mode<synchronous>, transform_indices = @transform_4, window_bounds = array<i64: 1, 32>}, {transform_indices = @transform_5, window_bounds = array<i64: 32, 128>}, {transform_indices = @transform_6, window_bounds = array<i64: 1, 128>}, {transform_indices = @transform_7, window_bounds = array<i64: 128, 32>}, {pipeline_mode = #tpu.pipeline_mode<synchronous>, transform_indices = @transform_8, window_bounds = array<i64: 1, 32>}, {pipeline_mode = #tpu.pipeline_mode<synchronous>, transform_indices = @transform_9, window_bounds = array<i64: 1, 32>}, {pipeline_mode = #tpu.pipeline_mode<synchronous>, transform_indices = @transform_10, window_bounds = array<i64: 1, 32>}, {pipeline_mode = #tpu.pipeline_mode<synchronous>, transform_indices = @transform_11, window_bounds = array<i64: 8, 32>}]} {
    %c0_i32 = arith.constant 0 : i32
    %0 = arith.cmpi eq, %arg0, %c0_i32 : i32
    %1 = arith.extui %0 : i1 to i32
    %c0_i32_0 = arith.constant 0 : i32
    %2 = arith.cmpi ne, %1, %c0_i32_0 : i32
    scf.if %2 {
      %c0_30 = arith.constant 0 : index
      %c0_31 = arith.constant 0 : index
      %61 = vector.load %arg1[%c0_30, %c0_31] : memref<8x32xf32, #tpu.memory_space<vmem>>, vector<8x32xf32>
      %c0_32 = arith.constant 0 : index
      %c0_33 = arith.constant 0 : index
      %62 = vector.load %arg2[%c0_32, %c0_33] : memref<32x32xf32, #tpu.memory_space<vmem>>, vector<32x32xf32>
      %cst_34 = arith.constant dense<0.000000e+00> : vector<8x32xf32>
      %63 = tpu.matmul %61, %62, %cst_34 {dimension_numbers = #tpu.dot_dimension_numbers<[1], [0], [0], [1], [0, 0, 1, 1], [], []>} : vector<8x32xf32>, vector<32x32xf32>, vector<8x32xf32> -> vector<8x32xf32>
      %c0_35 = arith.constant 0 : index
      %c0_36 = arith.constant 0 : index
      %64 = vector.load %arg3[%c0_35, %c0_36] : memref<1x32xf32, #tpu.memory_space<vmem>>, vector<1x32xf32>
      %65 = vector.broadcast %64 : vector<1x32xf32> to vector<8x32xf32>
      %66 = arith.addf %63, %65 : vector<8x32xf32>
      %67 = arith.addf %66, %61 : vector<8x32xf32>
      %c0_37 = arith.constant 0 : index
      %c0_38 = arith.constant 0 : index
      %68 = vector.load %arg4[%c0_37, %c0_38] : memref<1x32xf32, #tpu.memory_space<vmem>>, vector<1x32xf32>
      %c0_39 = arith.constant 0 : index
      %c0_40 = arith.constant 0 : index
      %69 = vector.load %arg5[%c0_39, %c0_40] : memref<1x32xf32, #tpu.memory_space<vmem>>, vector<1x32xf32>
      %cst_41 = arith.constant dense<0.000000e+00> : vector<8xf32>
      %70 = vector.multi_reduction <add>, %67, %cst_41 [1] : vector<8x32xf32> to vector<8xf32>
      %71 = vector.shape_cast %70 : vector<8xf32> to vector<8x1xf32>
      %cst_42 = arith.constant 3.200000e+01 : f32
      %72 = vector.broadcast %cst_42 : f32 to vector<8x1xf32>
      %73 = arith.divf %71, %72 : vector<8x1xf32>
      %74 = vector.broadcast %73 : vector<8x1xf32> to vector<8x32xf32>
      %75 = arith.subf %67, %74 : vector<8x32xf32>
      %76 = arith.mulf %75, %75 : vector<8x32xf32>
      %cst_43 = arith.constant dense<0.000000e+00> : vector<8xf32>
      %77 = vector.multi_reduction <add>, %76, %cst_43 [1] : vector<8x32xf32> to vector<8xf32>
      %78 = vector.shape_cast %77 : vector<8xf32> to vector<8x1xf32>
      %cst_44 = arith.constant 0.0322580636 : f32
      %79 = vector.broadcast %cst_44 : f32 to vector<8x1xf32>
      %80 = arith.mulf %78, %79 : vector<8x1xf32>
      %81 = math.sqrt %80 : vector<8x1xf32>
      %cst_45 = arith.constant 9.99999997E-7 : f32
      %82 = vector.broadcast %cst_45 : f32 to vector<8x1xf32>
      %83 = arith.addf %81, %82 : vector<8x1xf32>
      %84 = tpu.reciprocal %83 {approx = true} : vector<8x1xf32> -> vector<8x1xf32>
      %85 = arith.mulf %83, %84 : vector<8x1xf32>
      %cst_46 = arith.constant 2.000000e+00 : f32
      %86 = vector.broadcast %cst_46 : f32 to vector<8x1xf32>
      %87 = arith.subf %86, %85 : vector<8x1xf32>
      %88 = arith.mulf %84, %87 : vector<8x1xf32>
      %89 = vector.broadcast %88 : vector<8x1xf32> to vector<8x32xf32>
      %90 = arith.mulf %75, %89 : vector<8x32xf32>
      %91 = vector.broadcast %68 : vector<1x32xf32> to vector<8x32xf32>
      %92 = arith.mulf %91, %90 : vector<8x32xf32>
      %93 = vector.broadcast %69 : vector<1x32xf32> to vector<8x32xf32>
      %94 = arith.addf %92, %93 : vector<8x32xf32>
      %c0_47 = arith.constant 0 : index
      %c0_48 = arith.constant 0 : index
      %95 = vector.load %arg13[%c0_47, %c0_48] : memref<8x32xf32, #tpu.memory_space<vmem>>, vector<8x32xf32>
      tpu.vector_store %arg13[%c0_47, %c0_48], %94 {strides = array<i32>} : memref<8x32xf32, #tpu.memory_space<vmem>>, vector<8x32xf32>,
      %cst_49 = arith.constant 0.000000e+00 : f32
      %96 = vector.broadcast %cst_49 : f32 to vector<8x32xf32>
      %c0_50 = arith.constant 0 : index
      %c0_51 = arith.constant 0 : index
      %97 = vector.load %arg14[%c0_50, %c0_51] : memref<8x32xf32, #tpu.memory_space<vmem>>, vector<8x32xf32>
      tpu.vector_store %arg14[%c0_50, %c0_51], %96 {strides = array<i32>} : memref<8x32xf32, #tpu.memory_space<vmem>>, vector<8x32xf32>,
    } else {
    }
    %c0 = arith.constant 0 : index
    %c0_1 = arith.constant 0 : index
    %3 = vector.load %arg13[%c0, %c0_1] : memref<8x32xf32, #tpu.memory_space<vmem>>, vector<8x32xf32>
    %c0_2 = arith.constant 0 : index
    %c0_3 = arith.constant 0 : index
    %4 = vector.load %arg6[%c0_2, %c0_3] : memref<32x128xf32, #tpu.memory_space<vmem>>, vector<32x128xf32>
    %cst = arith.constant dense<0.000000e+00> : vector<8x128xf32>
    %5 = tpu.matmul %3, %4, %cst {dimension_numbers = #tpu.dot_dimension_numbers<[1], [0], [0], [1], [0, 0, 1, 1], [], []>} : vector<8x32xf32>, vector<32x128xf32>, vector<8x128xf32> -> vector<8x128xf32>
    %c0_4 = arith.constant 0 : index
    %c0_5 = arith.constant 0 : index
    %6 = vector.load %arg7[%c0_4, %c0_5] : memref<1x128xf32, #tpu.memory_space<vmem>>, vector<1x128xf32>
    %7 = vector.broadcast %6 : vector<1x128xf32> to vector<8x128xf32>
    %8 = arith.addf %5, %7 : vector<8x128xf32>
    %cst_6 = arith.constant 5.000000e-01 : f32
    %9 = vector.broadcast %cst_6 : f32 to vector<8x128xf32>
    %10 = arith.mulf %8, %9 : vector<8x128xf32>
    %cst_7 = arith.constant 0.707106769 : f32
    %11 = vector.broadcast %cst_7 : f32 to vector<8x128xf32>
    %12 = arith.mulf %8, %11 : vector<8x128xf32>
    %cst_8 = arith.constant 0.000000e+00 : f32
    %13 = vector.broadcast %cst_8 : f32 to vector<8x128xf32>
    %14 = arith.cmpf oge, %12, %13 : vector<8x128xf32>
    %cst_9 = arith.constant 1.000000e+00 : f32
    %cst_10 = arith.constant -1.000000e+00 : f32
    %15 = vector.broadcast %cst_9 : f32 to vector<8x128xf32>
    %16 = vector.broadcast %cst_10 : f32 to vector<8x128xf32>
    %17 = arith.select %14, %15, %16 : vector<8x128xi1>, vector<8x128xf32>
    %18 = math.absf %12 : vector<8x128xf32>
    %cst_11 = arith.constant 0.327591091 : f32
    %19 = vector.broadcast %cst_11 : f32 to vector<8x128xf32>
    %20 = arith.mulf %19, %18 : vector<8x128xf32>
    %cst_12 = arith.constant 1.000000e+00 : f32
    %21 = vector.broadcast %cst_12 : f32 to vector<8x128xf32>
    %22 = arith.addf %21, %20 : vector<8x128xf32>
    %23 = tpu.reciprocal %22 {approx = true} : vector<8x128xf32> -> vector<8x128xf32>
    %24 = arith.mulf %22, %23 : vector<8x128xf32>
    %cst_13 = arith.constant 2.000000e+00 : f32
    %25 = vector.broadcast %cst_13 : f32 to vector<8x128xf32>
    %26 = arith.subf %25, %24 : vector<8x128xf32>
    %27 = arith.mulf %23, %26 : vector<8x128xf32>
    %cst_14 = arith.constant 1.06140542 : f32
    %28 = vector.broadcast %cst_14 : f32 to vector<8x128xf32>
    %29 = arith.mulf %28, %27 : vector<8x128xf32>
    %cst_15 = arith.constant -1.45315206 : f32
    %30 = vector.broadcast %cst_15 : f32 to vector<8x128xf32>
    %31 = arith.addf %29, %30 : vector<8x128xf32>
    %32 = arith.mulf %31, %27 : vector<8x128xf32>
    %cst_16 = arith.constant 1.42141378 : f32
    %33 = vector.broadcast %cst_16 : f32 to vector<8x128xf32>
    %34 = arith.addf %32, %33 : vector<8x128xf32>
    %35 = arith.mulf %34, %27 : vector<8x128xf32>
    %cst_17 = arith.constant -0.284496725 : f32
    %36 = vector.broadcast %cst_17 : f32 to vector<8x128xf32>
    %37 = arith.addf %35, %36 : vector<8x128xf32>
    %38 = arith.mulf %37, %27 : vector<8x128xf32>
    %cst_18 = arith.constant 0.254829586 : f32
    %39 = vector.broadcast %cst_18 : f32 to vector<8x128xf32>
    %40 = arith.addf %38, %39 : vector<8x128xf32>
    %41 = arith.mulf %40, %27 : vector<8x128xf32>
    %cst_19 = arith.constant 0.000000e+00 : f32
    %42 = vector.broadcast %cst_19 : f32 to vector<8x128xf32>
    %43 = arith.subf %42, %18 : vector<8x128xf32>
    %44 = arith.mulf %43, %18 : vector<8x128xf32>
    %45 = math.exp %44 : vector<8x128xf32>
    %46 = arith.mulf %41, %45 : vector<8x128xf32>
    %cst_20 = arith.constant 1.000000e+00 : f32
    %47 = vector.broadcast %cst_20 : f32 to vector<8x128xf32>
    %48 = arith.subf %47, %46 : vector<8x128xf32>
    %49 = arith.mulf %17, %48 : vector<8x128xf32>
    %cst_21 = arith.constant 1.000000e+00 : f32
    %50 = vector.broadcast %cst_21 : f32 to vector<8x128xf32>
    %51 = arith.addf %50, %49 : vector<8x128xf32>
    %52 = arith.mulf %10, %51 : vector<8x128xf32>
    %c0_22 = arith.constant 0 : index
    %c0_23 = arith.constant 0 : index
    %53 = vector.load %arg14[%c0_22, %c0_23] : memref<8x32xf32, #tpu.memory_space<vmem>>, vector<8x32xf32>
    %c0_24 = arith.constant 0 : index
    %c0_25 = arith.constant 0 : index
    %54 = vector.load %arg8[%c0_24, %c0_25] : memref<128x32xf32, #tpu.memory_space<vmem>>, vector<128x32xf32>
    %cst_26 = arith.constant dense<0.000000e+00> : vector<8x32xf32>
    %55 = tpu.matmul %52, %54, %cst_26 {dimension_numbers = #tpu.dot_dimension_numbers<[1], [0], [0], [1], [0, 0, 1, 1], [], []>} : vector<8x128xf32>, vector<128x32xf32>, vector<8x32xf32> -> vector<8x32xf32>
    %56 = arith.addf %53, %55 : vector<8x32xf32>
    %c0_27 = arith.constant 0 : index
    %c0_28 = arith.constant 0 : index
    %57 = vector.load %arg14[%c0_27, %c0_28] : memref<8x32xf32, #tpu.memory_space<vmem>>, vector<8x32xf32>
    tpu.vector_store %arg14[%c0_27, %c0_28], %56 {strides = array<i32>} : memref<8x32xf32, #tpu.memory_space<vmem>>, vector<8x32xf32>,
    %c1_i32 = arith.constant 1 : i32
    %58 = arith.cmpi eq, %arg0, %c1_i32 : i32
    %59 = arith.extui %58 : i1 to i32
    %c0_i32_29 = arith.constant 0 : i32
    %60 = arith.cmpi ne, %59, %c0_i32_29 : i32
    scf.if %60 {
      %c0_30 = arith.constant 0 : index
      %c0_31 = arith.constant 0 : index
      %61 = vector.load %arg14[%c0_30, %c0_31] : memref<8x32xf32, #tpu.memory_space<vmem>>, vector<8x32xf32>
      %c0_32 = arith.constant 0 : index
      %c0_33 = arith.constant 0 : index
      %62 = vector.load %arg9[%c0_32, %c0_33] : memref<1x32xf32, #tpu.memory_space<vmem>>, vector<1x32xf32>
      %63 = vector.broadcast %62 : vector<1x32xf32> to vector<8x32xf32>
      %64 = arith.addf %61, %63 : vector<8x32xf32>
      %c0_34 = arith.constant 0 : index
      %c0_35 = arith.constant 0 : index
      %65 = vector.load %arg13[%c0_34, %c0_35] : memref<8x32xf32, #tpu.memory_space<vmem>>, vector<8x32xf32>
      %66 = arith.addf %64, %65 : vector<8x32xf32>
      %c0_36 = arith.constant 0 : index
      %c0_37 = arith.constant 0 : index
      %67 = vector.load %arg10[%c0_36, %c0_37] : memref<1x32xf32, #tpu.memory_space<vmem>>, vector<1x32xf32>
      %c0_38 = arith.constant 0 : index
      %c0_39 = arith.constant 0 : index
      %68 = vector.load %arg11[%c0_38, %c0_39] : memref<1x32xf32, #tpu.memory_space<vmem>>, vector<1x32xf32>
      %cst_40 = arith.constant dense<0.000000e+00> : vector<8xf32>
      %69 = vector.multi_reduction <add>, %66, %cst_40 [1] : vector<8x32xf32> to vector<8xf32>
      %70 = vector.shape_cast %69 : vector<8xf32> to vector<8x1xf32>
      %cst_41 = arith.constant 3.200000e+01 : f32
      %71 = vector.broadcast %cst_41 : f32 to vector<8x1xf32>
      %72 = arith.divf %70, %71 : vector<8x1xf32>
      %73 = vector.broadcast %72 : vector<8x1xf32> to vector<8x32xf32>
      %74 = arith.subf %66, %73 : vector<8x32xf32>
      %75 = arith.mulf %74, %74 : vector<8x32xf32>
      %cst_42 = arith.constant dense<0.000000e+00> : vector<8xf32>
      %76 = vector.multi_reduction <add>, %75, %cst_42 [1] : vector<8x32xf32> to vector<8xf32>
      %77 = vector.shape_cast %76 : vector<8xf32> to vector<8x1xf32>
      %cst_43 = arith.constant 0.0322580636 : f32
      %78 = vector.broadcast %cst_43 : f32 to vector<8x1xf32>
      %79 = arith.mulf %77, %78 : vector<8x1xf32>
      %80 = math.sqrt %79 : vector<8x1xf32>
      %cst_44 = arith.constant 9.99999997E-7 : f32
      %81 = vector.broadcast %cst_44 : f32 to vector<8x1xf32>
      %82 = arith.addf %80, %81 : vector<8x1xf32>
      %83 = tpu.reciprocal %82 {approx = true} : vector<8x1xf32> -> vector<8x1xf32>
      %84 = arith.mulf %82, %83 : vector<8x1xf32>
      %cst_45 = arith.constant 2.000000e+00 : f32
      %85 = vector.broadcast %cst_45 : f32 to vector<8x1xf32>
      %86 = arith.subf %85, %84 : vector<8x1xf32>
      %87 = arith.mulf %83, %86 : vector<8x1xf32>
      %88 = vector.broadcast %87 : vector<8x1xf32> to vector<8x32xf32>
      %89 = arith.mulf %74, %88 : vector<8x32xf32>
      %90 = vector.broadcast %67 : vector<1x32xf32> to vector<8x32xf32>
      %91 = arith.mulf %90, %89 : vector<8x32xf32>
      %92 = vector.broadcast %68 : vector<1x32xf32> to vector<8x32xf32>
      %93 = arith.addf %91, %92 : vector<8x32xf32>
      %c0_46 = arith.constant 0 : index
      %c0_47 = arith.constant 0 : index
      %94 = vector.load %arg12[%c0_46, %c0_47] : memref<8x32xf32, #tpu.memory_space<vmem>>, vector<8x32xf32>
      tpu.vector_store %arg12[%c0_46, %c0_47], %93 {strides = array<i32>} : memref<8x32xf32, #tpu.memory_space<vmem>>, vector<8x32xf32>,
    } else {
    }
    return
  }
  func.func @transform_0(%arg0: i32) -> (i32, i32) {
    %c0_i32 = arith.constant 0 : i32
    %c0_i32_0 = arith.constant 0 : i32
    %c0_i32_1 = arith.constant 0 : i32
    return %c0_i32, %c0_i32_0 : i32, i32
  }
  func.func @transform_1(%arg0: i32) -> (i32, i32) {
    %c0_i32 = arith.constant 0 : i32
    %c0_i32_0 = arith.constant 0 : i32
    %c0_i32_1 = arith.constant 0 : i32
    return %c0_i32, %c0_i32_0 : i32, i32
  }
  func.func @transform_2(%arg0: i32) -> (i32, i32) {
    %c0_i32 = arith.constant 0 : i32
    %c0_i32_0 = arith.constant 0 : i32
    %c0_i32_1 = arith.constant 0 : i32
    return %c0_i32, %c0_i32_0 : i32, i32
  }
  func.func @transform_3(%arg0: i32) -> (i32, i32) {
    %c0_i32 = arith.constant 0 : i32
    %c0_i32_0 = arith.constant 0 : i32
    %c0_i32_1 = arith.constant 0 : i32
    return %c0_i32, %c0_i32_0 : i32, i32
  }
  func.func @transform_4(%arg0: i32) -> (i32, i32) {
    %c0_i32 = arith.constant 0 : i32
    %c0_i32_0 = arith.constant 0 : i32
    %c0_i32_1 = arith.constant 0 : i32
    return %c0_i32, %c0_i32_0 : i32, i32
  }
  func.func @transform_5(%arg0: i32) -> (i32, i32) {
    %c0_i32 = arith.constant 0 : i32
    %c0_i32_0 = arith.constant 0 : i32
    return %c0_i32, %arg0 : i32, i32
  }
  func.func @transform_6(%arg0: i32) -> (i32, i32) {
    %c0_i32 = arith.constant 0 : i32
    %c0_i32_0 = arith.constant 0 : i32
    return %c0_i32, %arg0 : i32, i32
  }
  func.func @transform_7(%arg0: i32) -> (i32, i32) {
    %c0_i32 = arith.constant 0 : i32
    %c0_i32_0 = arith.constant 0 : i32
    return %arg0, %c0_i32 : i32, i32
  }
  func.func @transform_8(%arg0: i32) -> (i32, i32) {
    %c0_i32 = arith.constant 0 : i32
    %c0_i32_0 = arith.constant 0 : i32
    %c0_i32_1 = arith.constant 0 : i32
    return %c0_i32, %c0_i32_0 : i32, i32
  }
  func.func @transform_9(%arg0: i32) -> (i32, i32) {
    %c0_i32 = arith.constant 0 : i32
    %c0_i32_0 = arith.constant 0 : i32
    %c0_i32_1 = arith.constant 0 : i32
    return %c0_i32, %c0_i32_0 : i32, i32
  }
  func.func @transform_10(%arg0: i32) -> (i32, i32) {
    %c0_i32 = arith.constant 0 : i32
    %c0_i32_0 = arith.constant 0 : i32
    %c0_i32_1 = arith.constant 0 : i32
    return %c0_i32, %c0_i32_0 : i32, i32
  }
  func.func @transform_11(%arg0: i32) -> (i32, i32) {
    %c0_i32 = arith.constant 0 : i32
    %c0_i32_0 = arith.constant 0 : i32
    %c0_i32_1 = arith.constant 0 : i32
    return %c0_i32, %c0_i32_0 : i32, i32
  }
}

</mosaic_0001>

<bundles_post_ra>
// kernel: tpu_custom_call.1
= control target key start
LH: loop header
LB: loop body
LE: loop exit
PB: predicated region body
PF: predicated region fallthrough
CT: control target
= control target key end

     0   :  { %16 = vsyncpa [#allocation6], 0  ;;  %s971_s17 = smov 0   ;;  %s973_s18 = smov 0   ;;  %s1110_s0 = inlined_call_operand.vmem [shape: f32[8,32], index: 0, kind: input, shape index: {}]   ;;  %s1111_s1 = inlined_call_operand.vmem [shape: f32[32,32], index: 1, kind: input, shape index: {}]   ;;  %s1112_s2 = inlined_call_operand.vmem [shape: f32[1,32], index: 2, kind: input, shape index: {}]   ;;  %s1113_s3 = inlined_call_operand.vmem [shape: f32[1,32], index: 3, kind: input, shape index: {}]   ;;  %s1114_s4 = inlined_call_operand.vmem [shape: f32[1,32], index: 4, kind: input, shape index: {}]   ;;  %s1115_s5 = inlined_call_operand.vmem [shape: f32[32,256], index: 5, kind: input, shape index: {}]   ;;  %s1116_s6 = inlined_call_operand.vmem [shape: f32[1,256], index: 6, kind: input, shape index: {}]   ;;  %s1117_s7 = inlined_call_operand.vmem [shape: f32[256,32], index: 7, kind: input, shape index: {}]   ;;  %s1118_s8 = inlined_call_operand.vmem [shape: f32[1,32], index: 8, kind: input, shape index: {}]   ;;  %s1119_s9 = inlined_call_operand.vmem [shape: f32[1,32], index: 9, kind: input, shape index: {}]   ;;  %s1120_s10 = inlined_call_operand.vmem [shape: f32[1,32], index: 10, kind: input, shape index: {}]   ;;  %s1121_s11 = inlined_call_operand.hbm [shape: f32[8,32], index: 11, kind: output, shape index: {}]  }
   0x1   :  { %s975_s19 = smov 0  }
   0x2 LB: > { %s987_s20 = sadd.s32 4294967295, %s904_s19   ;;  %s990_s21 = sadd.s32 1, %s904_s19   ;;  %s904_s19 = sphi %s975_s19, %s1124_s19   ;;  %s900_s18 = sphi %s973_s18, %s1123_s18   ;;  %s896_s17 = sphi %s971_s17, %s1122_s17  }
   0x3   : > { %s131_s22 = ssub.s32 %s904_s19, %s990_s21  ;;  %s134_s23 = sadd.s32 1, %s900_s18 }
   0x4   : > { %p132_p0 = scmp.eq.s32.totalorder %s131_s22, 0  ;;  %p141_p1 = scmp.ne.s32.totalorder %s900_s18, %s896_s17 }
   0x5   : > { %p142_p2 = scmp.eq.s32.totalorder %s904_s19, 0  ;;  %p777_p4 = scmp.ge.s32.totalorder %s904_s19, 2 }
   0x6   : > { %s999_s24 = scalar_select %p132_p0, %s900_s18, %s134_s23  }
   0x7   : > { %p143_p3 = por %p142_p2, %p141_p1  ;;  %327 = sbr.rel (%p777_p4) target bundleno = 20 (0x14), region = 48 }
   0xc   : > { %330 = sbr.rel (!%p143_p3) target bundleno = 20 (0x14), region = 52  ;;  %s332_s25 = sand.u32 (%p143_p3), 1, %s900_s18  }
   0xd   : > { %s779_s26 = sshll.u32 (%p143_p3), %s904_s19, 3  ;;  %s778_s27 = sshll.u32 (%p143_p3), %s332_s25, 5 }
   0xe   : > { %s336_s30 = scalar_lea.vmem (%p143_p3), %s1115_s5, %s779_s26  ;;  %s334_s12 = scalar_lea.vmem (%p143_p3), [#allocation4], %s778_s27 }
   0xf   : > { %v371_v0 = vld [vmem:[%s336_s30] sm:$0xff] (%p143_p3)  ;;  %v373_v1 = vld [vmem:[%s336_s30 + $0x10] sm:$0xff] (%p143_p3) }
  0x10   : > { %v375_v2 = vld [vmem:[%s336_s30 + $0x20] sm:$0xff] (%p143_p3)  ;;  %372 = vst [vmem:[%s334_s12] sm:$0xff] (%p143_p3), %v371_v0  ;;  %v377_v3 = vld [vmem:[%s336_s30 + $0x30] sm:$0xff] (%p143_p3) }
  0x11   : > { %374 = vst [vmem:[%s334_s12 + $0x8] sm:$0xff] %v373_v1 }
  0x12   : > { %376 = vst [vmem:[%s334_s12 + $0x10] sm:$0xff] %v375_v2 }
  0x13   : > { %378 = vst [vmem:[%s334_s12 + $0x18] sm:$0xff] %v377_v3 }
  0x14 PF: > { %p780_p5 = scmp.ge.s32.totalorder %s904_s19, 1  ;;  %p398_p6 = scmp.lt.s32.totalorder %s904_s19, 3 }
  0x16   : > { %p399_p7 = pnand %p780_p5, %p398_p6 }
  0x17   : > { %s405_s13 = sand.u32 (!%p399_p7), 1, %s896_s17   ;;  %p447_p8 = scmp.lt.s32.totalorder (!%p399_p7), %s987_s20, 1 }
  0x18   : > { %402 = sbr.rel (%p399_p7) target bundleno = 1073 (0x431), region = 98  ;;  %s781_s14 = sshll.u32 (!%p399_p7), %s405_s13, 5 }
  0x19   : > { %s782_s15 = sshll.u32 (!%p399_p7), %s987_s20, 4  ;;  %s1024_s29 = scalar_lea.vmem (!%p399_p7), [#allocation4], %s781_s14 }
  0x1a   : > { %p451_p9 = scmp.lt.s32.totalorder (!%p399_p7), %s782_s15, 31  ;;  %p784_p10 = scmp.ne.s32.totalorder (!%p399_p7), %s987_s20, 0 }
  0x1d   : > { %s1013_s16 = scalar_select %p447_p8, %s987_s20, 1 }
  0x1e   : > { %s1126_s15 = smov (!%p451_p9, %s782_s15), 31  ;;  %459 = sbr.rel (%p784_p10) target bundleno = 458 (0x1ca), region = 106 }
  0x1f   : > { %s449_s25 = scalar_lea.vmem %s1116_s6, %s1013_s16  ;;  %s783_s19 = sshll.u32 %s1126_s15, 3 }
  0x20   : > { %s1022_s28 = scalar_lea.vmem %s1117_s7, %s783_s19 }
  0x23   : > { %v464_v4 = vld [vmem:[%s1111_s1 + $0x18] sm:$0xff]  ;;  %v463_v5 = vld [vmem:[%s1111_s1 + $0x10] sm:$0xff]  ;;  %vm469_vm0 = vcmask 261120   ;;  %v906_v6 = vmov 0.0   ;;  %v462_v7 = vld [vmem:[%s1111_s1 + $0x8] sm:$0xff]  ;;  %v907_v15 = vmov 32.0  }
  0x24   : > { %485 = vmatpush.msra.mxu0 %v464_v4  ;;  %540 = vst.msk [vmem:[#allocation3] sm:$0xff] %vm469_vm0, %v906_v6  ;;  %v461_v8 = vld [vmem:[%s1111_s1] sm:$0xff]  ;;  %830 = vrcp.f32 %v907_v15 }
  0x25   : > { %v460_v9 = vld [vmem:[%s1110_s0] sm:$0xff] }
  0x26   : > { %486 = vmatpush.msra.mxu0 %v463_v5  ;;  %v827_v10 = vld [vmem:[%s1112_s2] ss:$0 sm:$0xff] }
  0x27   : > { %v828_v43 = vld [vmem:[%s1113_s3] ss:$0 sm:$0xff] }
  0x28   : > { %487 = vmatpush.msra.mxu0 %v462_v7  ;;  %v829_v45 = vld [vmem:[%s1114_s4] ss:$0 sm:$0xff] }
  0x2a   : > { %488 = vmatpush.msra.mxu0 %v461_v8  ;;  %v831_v16 = vpop.eup %830 }
  0x2b   : > { %785 = vmatmul.msk.f32.vlgmr.msra.gmra.mxu0 %vm469_vm0, %v460_v9  ;;  %v500_v17 = vmul.f32 32.0, %v831_v16  ;;  %vm504_vm1 = vweird.f32 %v831_v16 }
  0x2d   : > { %v501_v18 = vsub.f32 1.0, %v500_v17 }
  0x2f   : > { %v502_v19 = vmul.f32 %v831_v16, %v501_v18 }
  0x31   : > { %v503_v20 = vadd.f32 %v831_v16, %v502_v19 }
  0x33   : > { %v505_v21 = vsel %vm504_vm1, %v831_v16, %v503_v20 }
  0xa8   : > { %v490_v11 = vpop.f32.mrf.mxu0 }
  0xa9   : > { %v491_v12 = vadd.f32 %v827_v10, %v490_v11 }
  0xab   : > { %v493_v13 = vadd.f32 %v491_v12, %v460_v9 }
  0xad   : > { %v496_v14 = vsel %vm469_vm0, %v493_v13, 0.0 }
  0xae   : > { %497 = vadd.xlane.f32.xlu0 %v496_v14 }
 0x121   : > { %v498_v22 = vpop.xlane.xlu0 %497 }
 0x122   : > { %v506_v23 = vmul.f32 %v505_v21, %v498_v22 }
 0x124   : > { %v507_v24 = vsub.f32 %v493_v13, %v506_v23 }
 0x126   : > { %v508_v25 = vmul.f32 %v507_v24, %v507_v24 }
 0x128   : > { %v509_v26 = vsel %vm469_vm0, %v508_v25, 0.0 }
 0x129   : > { %510 = vadd.xlane.f32.xlu0 %v509_v26 }
 0x19c   : > { %v511_v27 = vpop.xlane.xlu0 %510 }
 0x19d   : > { %v512_v28 = vmul.f32 0.032258064, %v511_v27 }
 0x19f   : > { %832 = vrsqrt.f32 %v512_v28  ;;  %vm520_vm2 = vcmp.eq.f32.partialorder %v512_v28, inf  ;;  %v523_v36 = vand.u32 2147483648, %v512_v28  ;;  %vm522_vm3 = vcmp.eq.f32.partialorder %v512_v28, 0.0 }
 0x1a5   : > { %v833_v29 = vpop.eup %832 }
 0x1a6   : > { %v514_v30 = vmul.f32 %v833_v29, %v512_v28 }
 0x1a8   : > { %v515_v31 = vmul.f32 %v833_v29, %v514_v30 }
 0x1aa   : > { %v516_v32 = vmul.f32 0.5, %v515_v31 }
 0x1ac   : > { %v517_v33 = vsub.f32 1.5, %v516_v32 }
 0x1ae   : > { %v518_v34 = vmul.f32 %v833_v29, %v517_v33 }
 0x1b0   : > { %v519_v35 = vmul.f32 %v518_v34, %v512_v28 }
 0x1b2   : > { %v521_v37 = vsel %vm520_vm2, %v512_v28, %v519_v35 }
 0x1b3   : > { %v524_v38 = vsel %vm522_vm3, %v523_v36, %v521_v37 }
 0x1b4   : > { %v525_v39 = vadd.f32 1e-06, %v524_v38 }
 0x1b6   : > { %834 = vrcp.f32 %v525_v39 }
 0x1bc   : > { %v835_v40 = vpop.eup %834 }
 0x1bd   : > { %v527_v41 = vmul.f32 %v835_v40, %v525_v39 }
 0x1bf   : > { %v528_v42 = vsub.f32 2.0, %v527_v41 }
 0x1c1   : > { %v529_v44 = vmul.f32 %v835_v40, %v528_v42 }
 0x1c3   : > { %v530_v46 = vmul.f32 %v529_v44, %v507_v24 }
 0x1c5   : > { %v534_v47 = vmul.f32 %v828_v43, %v530_v46 }
 0x1c7   : > { %v538_v48 = vadd.f32 %v829_v45, %v534_v47 }
 0x1c9   : > { %539 = vst.msk [vmem:[#allocation2] sm:$0xff] %vm469_vm0, %v538_v48 }
 0x1ca PF: > { %v545_v49 = vld [vmem:[%s1024_s29 + $0x18] sm:$0xff]  ;;  %v544_v50 = vld [vmem:[%s1024_s29 + $0x10] sm:$0xff]  ;;  %v543_v51 = vld [vmem:[%s1024_s29 + $0x8] sm:$0xff]  ;;  %vm550_vm4 = vcmask 261120   ;;  %v908_v32 = vmov -1.0   ;;  %p787_p11 = scmp.ne.s32.totalorder %s987_s20, 1 }
 0x1cb   : > { %566 = vmatpush.msra.mxu0 %v545_v49  ;;  %v542_v52 = vld [vmem:[%s1024_s29] sm:$0xff]  ;;  %v619_v54 = vld [vmem:[%s1022_s28 + $0x78] sm:$0xff]  ;;  %v617_v56 = vld [vmem:[%s1022_s28 + $0x68] sm:$0xff] }
 0x1cc   : > { %620 = vmatpush.msra.mxu1 %v619_v54  ;;  %v618_v55 = vld [vmem:[%s1022_s28 + $0x70] sm:$0xff]  ;;  %v616_v57 = vld [vmem:[%s1022_s28 + $0x60] sm:$0xff]  ;;  %v615_v58 = vld [vmem:[%s1022_s28 + $0x58] sm:$0xff] }
 0x1cd   : > { %567 = vmatpush.msra.mxu0 %v544_v50  ;;  %v614_v59 = vld [vmem:[%s1022_s28 + $0x50] sm:$0xff]  ;;  %v836_v60 = vld [vmem:[%s449_s25] ss:$0 sm:$0xff]  ;;  %v613_v61 = vld [vmem:[%s1022_s28 + $0x48] sm:$0xff] }
 0x1ce   : > { %621 = vmatpush.msra.mxu1 %v618_v55  ;;  %v612_v63 = vld [vmem:[%s1022_s28 + $0x40] sm:$0xff]  ;;  %v611_v1 = vld [vmem:[%s1022_s28 + $0x38] sm:$0xff]  ;;  %v610_v3 = vld [vmem:[%s1022_s28 + $0x30] sm:$0xff] }
 0x1cf   : > { %568 = vmatpush.msra.mxu0 %v543_v51  ;;  %v609_v5 = vld [vmem:[%s1022_s28 + $0x28] sm:$0xff]  ;;  %v608_v7 = vld [vmem:[%s1022_s28 + $0x20] sm:$0xff]  ;;  %v607_v9 = vld [vmem:[%s1022_s28 + $0x18] sm:$0xff] }
 0x1d0   : > { %v541_v53 = vld [vmem:[#allocation2] sm:$0xff]  ;;  %622 = vmatpush.msra.mxu1 %v617_v56  ;;  %v606_v10 = vld [vmem:[%s1022_s28 + $0x10] sm:$0xff]  ;;  %v605_v11 = vld [vmem:[%s1022_s28 + $0x8] sm:$0xff] }
 0x1d1   : > { %569 = vmatpush.msra.mxu0 %v542_v52  ;;  %v604_v12 = vld [vmem:[%s1022_s28] sm:$0xff]  ;;  %v603_v38 = vld [vmem:[#allocation3] sm:$0xff] }
 0x1d2   : > { %786 = vmatmul.msk.f32.vlgmr.msra.gmra.mxu0 %vm550_vm4, %v541_v53  ;;  %623 = vmatpush.msra.mxu1 %v616_v57 }
 0x1d4   : > { %624 = vmatpush.msra.mxu1 %v615_v58 }
 0x1d6   : > { %625 = vmatpush.msra.mxu1 %v614_v59 }
 0x1d8   : > { %626 = vmatpush.msra.mxu1 %v613_v61 }
 0x1da   : > { %627 = vmatpush.msra.mxu1 %v612_v63 }
 0x1dc   : > { %628 = vmatpush.msra.mxu1 %v611_v1 }
 0x1de   : > { %629 = vmatpush.msra.mxu1 %v610_v3 }
 0x1e0   : > { %630 = vmatpush.msra.mxu1 %v609_v5 }
 0x1e2   : > { %631 = vmatpush.msra.mxu1 %v608_v7 }
 0x1e4   : > { %632 = vmatpush.msra.mxu1 %v607_v9 }
 0x1e6   : > { %633 = vmatpush.msra.mxu1 %v606_v10 }
 0x1e8   : > { %634 = vmatpush.msra.mxu1 %v605_v11 }
 0x1ea   : > { %635 = vmatpush.msra.mxu1 %v604_v12 }
 0x24f   : > { %v571_v62 = vpop.f32.mrf.mxu0 }
 0x250   : > { %v572_v0 = vadd.f32 %v836_v60, %v571_v62 }
 0x252   : > { %v575_v2 = vmul.f32 0.70710677, %v572_v0  ;;  %v574_v35 = vmul.f32 0.5, %v572_v0 }
 0x254   : > { %v578_v4 = vand.u32 2147483647, %v575_v2  ;;  %vm576_vm5 = vcmp.ge.f32.partialorder %v575_v2, 0.0 }
 0x255   : > { %v577_v33 = vsel %vm576_vm5, 1.0, %v908_v32 }
 0x256   : > { %v579_v6 = vmul.f32 0.3275911, %v578_v4  ;;  %v594_v17 = vsub.f32 0.0, %v578_v4 }
 0x258   : > { %v580_v8 = vadd.f32 1.0, %v579_v6  ;;  %v595_v20 = vmul.f32 %v594_v17, %v578_v4 }
 0x25a   : > { %837 = vrcp.f32 %v580_v8  ;;  %v596_v23 = vmul.f32 1.442695, %v595_v20 }
 0x25c   : > { %839 = vpow2.f32 %v596_v23 }
 0x260   : > { %v838_v13 = vpop.eup %837 }
 0x261   : > { %v582_v14 = vmul.f32 %v838_v13, %v580_v8 }
 0x262   : > { %v840_v29 = vpop.eup %839 }
 0x263   : > { %v583_v15 = vsub.f32 2.0, %v582_v14 }
 0x265   : > { %v584_v16 = vmul.f32 %v838_v13, %v583_v15 }
 0x267   : > { %v585_v18 = vmul.f32 1.0614054, %v584_v16 }
 0x269   : > { %v586_v19 = vadd.f32 -1.4531521, %v585_v18 }
 0x26b   : > { %v587_v21 = vmul.f32 %v586_v19, %v584_v16 }
 0x26d   : > { %v588_v22 = vadd.f32 1.4214138, %v587_v21 }
 0x26f   : > { %v589_v24 = vmul.f32 %v588_v22, %v584_v16 }
 0x271   : > { %v590_v25 = vadd.f32 -0.28449672, %v589_v24 }
 0x273   : > { %v591_v26 = vmul.f32 %v590_v25, %v584_v16 }
 0x275   : > { %v592_v27 = vadd.f32 0.2548296, %v591_v26 }
 0x277   : > { %v593_v28 = vmul.f32 %v592_v27, %v584_v16 }
 0x279   : > { %v598_v30 = vmul.f32 %v840_v29, %v593_v28 }
 0x27b   : > { %v599_v31 = vsub.f32 1.0, %v598_v30 }
 0x27d   : > { %v600_v34 = vmul.f32 %v599_v31, %v577_v33 }
 0x27f   : > { %v601_v36 = vadd.f32 1.0, %v600_v34 }
 0x281   : > { %v602_v37 = vmul.f32 %v601_v36, %v574_v35 }
 0x283   : > { %636 = vmatmul.f32.vlgmr.msra.gmra.mxu1 %v602_v37 }
 0x2ff   : > { %645 = sbr.rel (%p787_p11) target bundleno = 1068 (0x42c), region = 110 }
 0x300   : > { %v637_v39 = vpop.f32.mrf.mxu1 }
 0x301   : > { %v640_v40 = vadd.f32 %v637_v39, %v603_v38 }
 0x303   : > { %641 = vst.msk [vmem:[#allocation3] sm:$0xff] %vm550_vm4, %v640_v40 }
 0x304   : > { %v841_v42 = vld [vmem:[%s1118_s8] ss:$0 sm:$0xff]  ;;  %v909_v47 = vmov 32.0  }
 0x305   : > { %v652_v43 = vld [vmem:[#allocation2] sm:$0xff]  ;;  %844 = vrcp.f32 %v909_v47 }
 0x306   : > { %v842_v11 = vld [vmem:[%s1119_s9] ss:$0 sm:$0xff] }
 0x307   : > { %v843_v13 = vld [vmem:[%s1120_s10] ss:$0 sm:$0xff] }
 0x30a   : > { %v646_v41 = vld [vmem:[#allocation3] sm:$0xff] }
 0x30b   : > { %v651_v44 = vadd.f32 %v841_v42, %v646_v41  ;;  %v845_v48 = vpop.eup %844 }
 0x30c   : > { %v660_v49 = vmul.f32 32.0, %v845_v48  ;;  %vm664_vm6 = vweird.f32 %v845_v48 }
 0x30d   : > { %v653_v45 = vadd.f32 %v652_v43, %v651_v44 }
 0x30e   : > { %v661_v50 = vsub.f32 1.0, %v660_v49 }
 0x30f   : > { %v656_v46 = vsel %vm550_vm4, %v653_v45, 0.0 }
 0x310   : > { %657 = vadd.xlane.f32.xlu0 %v656_v46  ;;  %v662_v51 = vmul.f32 %v845_v48, %v661_v50 }
 0x312   : > { %v663_v52 = vadd.f32 %v845_v48, %v662_v51 }
 0x314   : > { %v665_v53 = vsel %vm664_vm6, %v845_v48, %v663_v52 }
 0x383   : > { %v658_v54 = vpop.xlane.xlu0 %657 }
 0x384   : > { %v666_v55 = vmul.f32 %v665_v53, %v658_v54 }
 0x386   : > { %v667_v56 = vsub.f32 %v653_v45, %v666_v55 }
 0x388   : > { %v668_v57 = vmul.f32 %v667_v56, %v667_v56 }
 0x38a   : > { %v669_v58 = vsel %vm550_vm4, %v668_v57, 0.0 }
 0x38b   : > { %670 = vadd.xlane.f32.xlu0 %v669_v58 }
 0x3fe   : > { %v671_v59 = vpop.xlane.xlu0 %670 }
 0x3ff   : > { %v672_v60 = vmul.f32 0.032258064, %v671_v59 }
 0x401   : > { %846 = vrsqrt.f32 %v672_v60  ;;  %vm680_vm7 = vcmp.eq.f32.partialorder %v672_v60, inf  ;;  %v683_v4 = vand.u32 2147483648, %v672_v60  ;;  %vm682_vm8 = vcmp.eq.f32.partialorder %v672_v60, 0.0 }
 0x407   : > { %v847_v61 = vpop.eup %846 }
 0x408   : > { %v674_v62 = vmul.f32 %v847_v61, %v672_v60 }
 0x40a   : > { %v675_v63 = vmul.f32 %v847_v61, %v674_v62 }
 0x40c   : > { %v676_v0 = vmul.f32 0.5, %v675_v63 }
 0x40e   : > { %v677_v1 = vsub.f32 1.5, %v676_v0 }
 0x410   : > { %v678_v2 = vmul.f32 %v847_v61, %v677_v1 }
 0x412   : > { %v679_v3 = vmul.f32 %v678_v2, %v672_v60 }
 0x414   : > { %v681_v5 = vsel %vm680_vm7, %v672_v60, %v679_v3 }
 0x415   : > { %v684_v6 = vsel %vm682_vm8, %v683_v4, %v681_v5 }
 0x416   : > { %v685_v7 = vadd.f32 1e-06, %v684_v6 }
 0x418   : > { %848 = vrcp.f32 %v685_v7 }
 0x41e   : > { %v849_v8 = vpop.eup %848 }
 0x41f   : > { %v687_v9 = vmul.f32 %v849_v8, %v685_v7 }
 0x421   : > { %v688_v10 = vsub.f32 2.0, %v687_v9 }
 0x423   : > { %v689_v12 = vmul.f32 %v849_v8, %v688_v10 }
 0x425   : > { %v690_v14 = vmul.f32 %v689_v12, %v667_v56 }
 0x427   : > { %v694_v15 = vmul.f32 %v842_v11, %v690_v14 }
 0x429   : > { %v698_v16 = vadd.f32 %v843_v13, %v694_v15 }
 0x42b   : > { %699 = vst.msk [vmem:[#allocation5] sm:$0xff] %vm550_vm4, %v698_v16 }
 0x42c PF: > { %p796_p12 = scmp.eq.s32.totalorder %s987_s20, 1  ;;  %s910_s26 = smov [#allocation5]  }
 0x42d   : > { %s706_s27 = sshll.u32 %s910_s26, 4  ;;  %s708_s12 = sshll.u32 %s1121_s11, 4  ;;  %s707_s27 = int_to_ptr.vmem [resolvable:$true] %s706_s27  ;;  %s709_s12 = int_to_ptr.hbm [resolvable:$true] %s708_s12 }
 0x42e   : > { %793 = dma.vmem_to_hbm [thread:$0]  (%p796_p12), %s707_s27, 128, %s709_s12, [#allocation6]  }
 0x42f   : > { %891 = dma.done.wait (%p796_p12), [#allocation6], 128  }
 0x430   : > { %893 = vsyncadd (%p796_p12), [#allocation6], 4294967168 }
 0x431 PF: > { %p19_p13 = scmp.ge.s32.totalorder %s990_s21, 4   ;;  %s1122_s17 = smov %s900_s18 }
 0x432   : > { %s1123_s18 = smov %s999_s24  ;;  %s1124_s19 = smov %s990_s21 }
 0x433   :  { %21 = sbr.rel (!%p19_p13) target bundleno = 2 (0x2), region = 148 }
 0x438   :  { %722 = vsyncpa [#allocation6], 1 }
 0x439   :  { %724 = vsyncpa [#allocation6 + $0x1], 1 }

</bundles_post_ra>
